<compile_context>
chip_gen: v7x
topology: tpu7x:2x2x1
jax: 0.10.0
libtpu: 0.0.40
codegen_flags: <defaults>
</compile_context>

<pallas_src>
import math

import jax
import jax.numpy as jnp
from jax import lax
from jax.experimental import pallas as pl
from jax.experimental.pallas import tpu as pltpu


# ----------------------------------------------------------------------------
# Kernel
# ----------------------------------------------------------------------------
def _make_swiglu_kernel(F_dim, tf, out_is_f32):
    """Build the fused SwiGLU-MLP kernel for one (row-tile, ffn-tile) step."""
    mask_needed = (F_dim % tf) != 0
    dn = (((1,), (1,)), ((), ()))  # contract last dims of both operands (A @ B.T)

    def kernel(x_ref, w1_ref, w2_ref, o_ref, *scratch):
        # x_ref : (tm, H)      bf16 input rows
        # w1_ref: (2, tf, H)   bf16 gate/up slices of dense_h_to_4h.weight
        # w2_ref: (H, tf)      bf16 slice of dense_4h_to_h.weight (PyTorch layout)
        # o_ref : (tm, H)      output rows, resident across the ffn axis
        f = pl.program_id(1)
        acc_ref = o_ref if out_is_f32 else scratch[0]

        @pl.when(f == 0)
        def _():
            acc_ref[...] = jnp.zeros_like(acc_ref)

        x = x_ref[...]
        gate = lax.dot_general(x, w1_ref[0], dn, preferred_element_type=jnp.float32)
        up = lax.dot_general(x, w1_ref[1], dn, preferred_element_type=jnp.float32)
        inter = (gate * jax.nn.sigmoid(gate)) * up          # silu(gate) * up, f32

        w2 = w2_ref[...]
        if mask_needed:
            # Last ffn tile is partial: zero the out-of-range columns of BOTH
            # the intermediate and the W2 slice, so out-of-bounds garbage can
            # never reach the accumulator (0 * 0, never 0 * inf/NaN).
            valid = F_dim - f * tf
            col = lax.broadcasted_iota(jnp.int32, (1, tf), 1)
            in_range = col < valid
            inter = jnp.where(in_range, inter, 0.0)
            w2 = jnp.where(in_range, w2, jnp.zeros_like(w2))

        acc_ref[...] += lax.dot_general(
            inter.astype(w2.dtype), w2, dn, preferred_element_type=jnp.float32)

        if not out_is_f32:
            @pl.when(f == pl.num_programs(1) - 1)
            def _():
                o_ref[...] = acc_ref[...].astype(o_ref.dtype)

    return kernel


# ----------------------------------------------------------------------------
# Tiling / VMEM budgeting
# ----------------------------------------------------------------------------
def _vmem_limit_bytes():
    cap = 64 << 20  # conservative default: v7x physical VMEM
    try:
        cap = int(pltpu.get_tpu_info().vmem_capacity_bytes)
    except Exception:
        pass
    # ~100 MiB on 128 MiB chips (v5e/v6e), ~56 MiB on 64 MiB chips (v7x).
    return min(cap - (8 << 20), 100 << 20)


def _choose_tiles(M, H, F_dim, budget_bytes, x_bytes, w_bytes, out_bytes, need_acc):
    # tf must be a multiple of 128 (lane dim of the W2 block) or equal F.
    tf_cands = [c for c in (512, 256, 128) if c <= F_dim] or [F_dim]
    # tm must be a multiple of 8 (sublane dim) or equal M. Prefer large tm:
    # weights are re-streamed from HBM once per row tile, so HBM traffic
    # scales as (M/tm) * 3*H*F.
    tm_cands = [c for c in (1024, 512, 256, 128, 64, 32, 16, 8) if c <= M] or [M]

    def vmem(tm, tf):
        w = 2 * (3 * tf * H) * w_bytes              # (2,tf,H)+(H,tf), double-buffered
        xo = 2 * tm * H * (x_bytes + out_bytes)     # x + out, double-buffered
        acc = tm * H * 4 if need_acc else 0
        return w + xo + acc

    for tf in tf_cands:                 # prefer MXU-friendly tf = 512 first,
        for tm in tm_cands:             # then the largest row tile that fits
            if vmem(tm, tf) <= budget_bytes:
                return tm, tf
    return tm_cands[-1], tf_cands[-1]


# ----------------------------------------------------------------------------
# Wrapper
# ----------------------------------------------------------------------------
def chatglm_mlp_forward(hidden_states, w1, w2):
    """ChatGLM MLP forward (bias-free SwiGLU MLP).

    hidden_states : (..., H)   e.g. (seq, batch, hidden)
    w1            : (2*F, H)   dense_h_to_4h.weight (PyTorch layout)
    w2            : (H, F)     dense_4h_to_h.weight (PyTorch layout)
    """
    # TODO(synk): add_bias_linear=True bias path not implemented (config default is False).
    orig_shape = hidden_states.shape
    orig_dtype = hidden_states.dtype
    H = orig_shape[-1]
    F_dim = w1.shape[0] // 2
    M = int(math.prod(orig_shape[:-1]))

    # Feed the MXU bf16. These are element-wise casts plus a contiguous
    # reshape (no transposes); in a real model the weights would already be
    # stored pre-cast in bf16, making this free.
    compute_dtype = jnp.bfloat16
    x2d = hidden_states.reshape(M, H).astype(compute_dtype)
    w1_3d = w1.reshape(2, F_dim, H).astype(compute_dtype)   # [0] = gate, [1] = up
    w2_c = w2.astype(compute_dtype)                         # keep (H, F) layout

    out_is_f32 = orig_dtype == jnp.float32
    out_bytes = jnp.dtype(orig_dtype).itemsize

    vmem_limit = _vmem_limit_bytes()
    tm, tf = _choose_tiles(
        M, H, F_dim,
        budget_bytes=int(vmem_limit * 0.85),
        x_bytes=2, w_bytes=2, out_bytes=out_bytes,
        need_acc=not out_is_f32,
    )
    grid = (pl.cdiv(M, tm), pl.cdiv(F_dim, tf))

    kernel = _make_swiglu_kernel(F_dim, tf, out_is_f32)
    scratch_shapes = () if out_is_f32 else (pltpu.VMEM((tm, H), jnp.float32),)

    # TODO(synk): for tiny-M decode on v7x, split the ffn reduction across the
    # two TensorCores (per-core partial accumulators + combine) so the second
    # core is not idle.
    out = pl.pallas_call(
        kernel,
        out_shape=jax.ShapeDtypeStruct((M, H), orig_dtype),
        grid_spec=pltpu.PrefetchScalarGridSpec(
            num_scalar_prefetch=0,
            grid=grid,
            in_specs=[
                pl.BlockSpec((tm, H), lambda i, f: (i, 0)),        # x rows
                pl.BlockSpec((2, tf, H), lambda i, f: (0, f, 0)),  # W1 gate/up slices
                pl.BlockSpec((H, tf), lambda i, f: (0, f)),        # W2 slice
            ],
            out_specs=pl.BlockSpec((tm, H), lambda i, f: (i, 0)),
            scratch_shapes=scratch_shapes,
        ),
        compiler_params=pltpu.CompilerParams(
            dimension_semantics=("parallel", "arbitrary"),
            vmem_limit_bytes=vmem_limit,
        ),
    )(x2d, w1_3d, w2_c)

    return out.reshape(orig_shape)


# ----------------------------------------------------------------------------
# Reference + test
# ----------------------------------------------------------------------------
def _reference(hidden_states, w1, w2):
    h = hidden_states @ w1.T
    F_dim = w1.shape[0] // 2
    gate, up = h[..., :F_dim], h[..., F_dim:]
    act = jax.nn.silu(gate) * up
    return act @ w2.T


if __name__ == "__main__":
    key = jax.random.PRNGKey(0)

    def run_case(seq, batch, hidden, ffn):
        k = jax.random.fold_in(key, seq * 100003 + ffn)
        k1, k2, k3 = jax.random.split(k, 3)
        x = jax.random.normal(k1, (seq, batch, hidden), dtype=jnp.float32)
        w1 = jax.random.normal(k2, (2 * ffn, hidden), dtype=jnp.float32) * 0.02
        w2 = jax.random.normal(k3, (hidden, ffn), dtype=jnp.float32) * 0.02

        out = jax.block_until_ready(chatglm_mlp_forward(x, w1, w2))
        ref = _reference(x, w1, w2)

        assert out.shape == x.shape, out.shape
        assert out.dtype == x.dtype, out.dtype
        err = float(jnp.max(jnp.abs(out - ref)))
        scale = float(jnp.max(jnp.abs(ref))) + 1e-6
        # bf16 MXU feed -> small drift vs the f32 reference is expected.
        assert err <= 1e-2 + 1e-2 * scale, (err, scale)

    # Evenly divisible tiles (tm | M, tf | ffn).
    run_case(seq=8, batch=2, hidden=256, ffn=512)
    # Non-divisible rows and ffn: exercises the cdiv grid + masked last tile.
    run_case(seq=6, batch=4, hidden=256, ffn=640)

    print("KERNEL_OK")
</pallas_src>

<mosaic_0001>
module attributes {stable_mosaic.version = 11 : i64} {
  func.func @kernel(%arg0: i32, %arg1: i32, %arg2: memref<16x256xbf16, #tpu.memory_space<vmem>>, %arg3: memref<2x512x256xbf16, #tpu.memory_space<vmem>>, %arg4: memref<256x512xbf16, #tpu.memory_space<vmem>>, %arg5: memref<16x256xf32, #tpu.memory_space<vmem>>) attributes {dimension_semantics = [#tpu.dimension_semantics<parallel>, #tpu.dimension_semantics<arbitrary>], iteration_bounds = array<i64: 1, 1>, scalar_prefetch = 0 : i64, scratch_operands = 0 : i64, tpu.core_type = #tpu.core_type<tc>, window_params = [{transform_indices = @transform_0, window_bounds = array<i64: 16, 256>}, {transform_indices = @transform_1, window_bounds = array<i64: 2, 512, 256>}, {transform_indices = @transform_2, window_bounds = array<i64: 256, 512>}, {transform_indices = @transform_3, window_bounds = array<i64: 16, 256>}]} {
    %c0_i32 = arith.constant 0 : i32
    %0 = arith.cmpi eq, %arg1, %c0_i32 : i32
    %1 = arith.extui %0 : i1 to i32
    %c0_i32_0 = arith.constant 0 : i32
    %2 = arith.cmpi ne, %1, %c0_i32_0 : i32
    scf.if %2 {
      %cst_16 = arith.constant 0.000000e+00 : f32
      %23 = vector.broadcast %cst_16 : f32 to vector<16x256xf32>
      %c0_17 = arith.constant 0 : index
      %c0_18 = arith.constant 0 : index
      %24 = vector.load %arg5[%c0_17, %c0_18] : memref<16x256xf32, #tpu.memory_space<vmem>>, vector<16x256xf32>
      tpu.vector_store %arg5[%c0_17, %c0_18], %23 {strides = array<i32>} : memref<16x256xf32, #tpu.memory_space<vmem>>, vector<16x256xf32>,
    } else {
    }
    %c0 = arith.constant 0 : index
    %c0_1 = arith.constant 0 : index
    %3 = vector.load %arg2[%c0, %c0_1] : memref<16x256xbf16, #tpu.memory_space<vmem>>, vector<16x256xbf16>
    %c0_2 = arith.constant 0 : index
    %c0_3 = arith.constant 0 : index
    %c0_4 = arith.constant 0 : index
    %4 = vector.load %arg3[%c0_2, %c0_3, %c0_4] : memref<2x512x256xbf16, #tpu.memory_space<vmem>>, vector<1x512x256xbf16>
    %5 = vector.shape_cast %4 : vector<1x512x256xbf16> to vector<512x256xbf16>
    %cst = arith.constant dense<0.000000e+00> : vector<16x512xf32>
    %6 = tpu.matmul %3, %5, %cst {dimension_numbers = #tpu.dot_dimension_numbers<[1], [1], [0], [0], [0, 0, 1, 0], [], []>} : vector<16x256xbf16>, vector<512x256xbf16>, vector<16x512xf32> -> vector<16x512xf32>
    %c1 = arith.constant 1 : index
    %c0_5 = arith.constant 0 : index
    %c0_6 = arith.constant 0 : index
    %7 = vector.load %arg3[%c1, %c0_5, %c0_6] : memref<2x512x256xbf16, #tpu.memory_space<vmem>>, vector<1x512x256xbf16>
    %8 = vector.shape_cast %7 : vector<1x512x256xbf16> to vector<512x256xbf16>
    %cst_7 = arith.constant dense<0.000000e+00> : vector<16x512xf32>
    %9 = tpu.matmul %3, %8, %cst_7 {dimension_numbers = #tpu.dot_dimension_numbers<[1], [1], [0], [0], [0, 0, 1, 0], [], []>} : vector<16x256xbf16>, vector<512x256xbf16>, vector<16x512xf32> -> vector<16x512xf32>
    %10 = arith.negf %6 : vector<16x512xf32>
    %11 = math.exp %10 : vector<16x512xf32>
    %cst_8 = arith.constant 1.000000e+00 : f32
    %12 = vector.broadcast %cst_8 : f32 to vector<16x512xf32>
    %13 = arith.addf %12, %11 : vector<16x512xf32>
    %14 = arith.divf %12, %13 : vector<16x512xf32>
    %15 = arith.mulf %6, %14 : vector<16x512xf32>
    %16 = arith.mulf %15, %9 : vector<16x512xf32>
    %c0_9 = arith.constant 0 : index
    %c0_10 = arith.constant 0 : index
    %17 = vector.load %arg4[%c0_9, %c0_10] : memref<256x512xbf16, #tpu.memory_space<vmem>>, vector<256x512xbf16>
    %c0_11 = arith.constant 0 : index
    %c0_12 = arith.constant 0 : index
    %18 = vector.load %arg5[%c0_11, %c0_12] : memref<16x256xf32, #tpu.memory_space<vmem>>, vector<16x256xf32>
    %19 = arith.truncf %16 : vector<16x512xf32> to vector<16x512xbf16>
    %cst_13 = arith.constant dense<0.000000e+00> : vector<16x256xf32>
    %20 = tpu.matmul %19, %17, %cst_13 {dimension_numbers = #tpu.dot_dimension_numbers<[1], [1], [0], [0], [0, 0, 1, 0], [], []>} : vector<16x512xbf16>, vector<256x512xbf16>, vector<16x256xf32> -> vector<16x256xf32>
    %21 = arith.addf %18, %20 : vector<16x256xf32>
    %c0_14 = arith.constant 0 : index
    %c0_15 = arith.constant 0 : index
    %22 = vector.load %arg5[%c0_14, %c0_15] : memref<16x256xf32, #tpu.memory_space<vmem>>, vector<16x256xf32>
    tpu.vector_store %arg5[%c0_14, %c0_15], %21 {strides = array<i32>} : memref<16x256xf32, #tpu.memory_space<vmem>>, vector<16x256xf32>,
    return
  }
  func.func @transform_0(%arg0: i32, %arg1: i32) -> (i32, i32) {
    %c0_i32 = arith.constant 0 : i32
    %c0_i32_0 = arith.constant 0 : i32
    return %arg0, %c0_i32 : i32, i32
  }
  func.func @transform_1(%arg0: i32, %arg1: i32) -> (i32, i32, i32) {
    %c0_i32 = arith.constant 0 : i32
    %c0_i32_0 = arith.constant 0 : i32
    %c0_i32_1 = arith.constant 0 : i32
    return %c0_i32, %arg1, %c0_i32_0 : i32, i32, i32
  }
  func.func @transform_2(%arg0: i32, %arg1: i32) -> (i32, i32) {
    %c0_i32 = arith.constant 0 : i32
    %c0_i32_0 = arith.constant 0 : i32
    return %c0_i32, %arg1 : i32, i32
  }
  func.func @transform_3(%arg0: i32, %arg1: i32) -> (i32, i32) {
    %c0_i32 = arith.constant 0 : i32
    %c0_i32_0 = arith.constant 0 : i32
    return %arg0, %c0_i32 : i32, i32
  }
}

</mosaic_0001>

<bundles_post_ra>
// kernel: tpu_custom_call.1
= control target key start
LH: loop header
LB: loop body
LE: loop exit
PB: predicated region body
PF: predicated region fallthrough
CT: control target
= control target key end

     0   :  { %8 = vsyncpa [#allocation3], 0  ;;  %s2318_s0 = inlined_call_operand.hbm [shape: bf16[16,256], index: 0, kind: input, shape index: {}]   ;;  %s2319_s1 = inlined_call_operand.hbm [shape: bf16[2,512,256], index: 1, kind: input, shape index: {}]   ;;  %s2320_s2 = inlined_call_operand.hbm [shape: bf16[256,512], index: 2, kind: input, shape index: {}]   ;;  %s2321_s3 = inlined_call_operand.hbm [shape: f32[16,256], index: 3, kind: output, shape index: {}]  }
   0x1   :  { %9 = vsyncpa [#allocation6], 0 }
   0x2   :  { %10 = vsyncpa [#allocation4], 0  ;;  %s2217_s12 = smov [#allocation5]   ;;  %s2218_s14 = smov [#allocation2]  }
   0x3   :  { %s28_s13 = sshll.u32 %s2217_s12, 4  ;;  %s16_s15 = sshll.u32 %s2218_s14, 4  ;;  %s29_s13 = int_to_ptr.vmem [resolvable:$true] %s28_s13  ;;  %s2245_s15 = int_to_ptr.vmem [resolvable:$true] %s16_s15 }
   0x4   :  { %s2123_s18 = scalar_lea.hbm %s2319_s1, 16384 }
   0x5   :  { %p2124_p0 = scmp.ne.s32.totalorder %s2319_s1, %s2123_s18  ;;  %p2127_p1 = scmp.lt.u32.totalorder %s2123_s18, %s2319_s1 }
   0x7   :  { %p2129_p2 = pnand %p2127_p1, %p2124_p0 }
   0x9   :  { %2132 = shalt.err (!%p2129_p2)
}
   0xa   :  { %s2133_s23 = scalar_lea.vmem %s29_s13, 16384  ;;  %p2138_p4 = scmp.lt.s32.totalorder %s29_s13, %s29_s13 }
   0xb   :  { %p2134_p3 = scmp.ne.s32.totalorder %s29_s13, %s2133_s23  ;;  %p2139_p5 = scmp.lt.s32.totalorder %s2133_s23, %s2133_s23 }
   0xd   :  { %p2140_p6 = por %p2139_p5, %p2138_p4 }
   0xf   :  { %p2141_p7 = pnand %p2140_p6, %p2134_p3 }
  0x11   :  { %2144 = shalt.err (!%p2141_p7)
}
  0x12   :  { %s2219_s24 = smov 128   ;;  %s2220_s25 = smov 8  }
  0x13   :  { %34 = dma.hbm_to_vmem [thread:$0]  %s2319_s1, 16384, %s29_s13, [#allocation6], %s2219_s24, %s2219_s24, %s2220_s25  }
  0x14   :  { %s2145_s30 = scalar_lea.hbm %s2318_s0, 256 }
  0x15   :  { %p2146_p8 = scmp.ne.s32.totalorder %s2318_s0, %s2145_s30  ;;  %p2149_p9 = scmp.lt.u32.totalorder %s2145_s30, %s2318_s0 }
  0x17   :  { %p2151_p10 = pnand %p2149_p9, %p2146_p8 }
  0x19   :  { %2154 = shalt.err (!%p2151_p10)
}
  0x1a   :  { %s2155_s8 = scalar_lea.vmem %s2245_s15, 256  ;;  %p2160_p12 = scmp.lt.s32.totalorder %s2245_s15, %s2245_s15 }
  0x1b   :  { %p2156_p11 = scmp.ne.s32.totalorder %s2245_s15, %s2155_s8  ;;  %p2161_p13 = scmp.lt.s32.totalorder %s2155_s8, %s2155_s8 }
  0x1d   :  { %p2162_p0 = por %p2161_p13, %p2160_p12 }
  0x1f   :  { %p2163_p1 = pnand %p2162_p0, %p2156_p11 }
  0x21   :  { %2166 = shalt.err (!%p2163_p1)
}
  0x22   :  { %22 = dma.hbm_to_vmem [thread:$0]  %s2318_s0, 256, %s2245_s15, [#allocation3], %s2219_s24, %s2219_s24, %s2220_s25  }
  0x23   :  { %s2221_s10 = smov [#allocation7]   ;;  %s2167_s14 = scalar_lea.hbm %s2320_s2, 8192 }
  0x24   :  { %s40_s11 = sshll.u32 %s2221_s10, 4  ;;  %p2168_p2 = scmp.ne.s32.totalorder %s2320_s2, %s2167_s14  ;;  %s41_s11 = int_to_ptr.vmem [resolvable:$true] %s40_s11 }
  0x25   :  { %p2171_p3 = scmp.lt.u32.totalorder %s2167_s14, %s2320_s2 }
  0x27   :  { %p2173_p4 = pnand %p2171_p3, %p2168_p2 }
  0x29   :  { %2176 = shalt.err (!%p2173_p4)
}
  0x2a   :  { %s2177_s20 = scalar_lea.vmem %s41_s11, 8192  ;;  %p2182_p6 = scmp.lt.s32.totalorder %s41_s11, %s41_s11 }
  0x2b   :  { %p2178_p5 = scmp.ne.s32.totalorder %s41_s11, %s2177_s20  ;;  %p2183_p7 = scmp.lt.s32.totalorder %s2177_s20, %s2177_s20 }
  0x2d   :  { %p2184_p8 = por %p2183_p7, %p2182_p6 }
  0x2f   :  { %p2185_p9 = pnand %p2184_p8, %p2178_p5 }
  0x31   :  { %2188 = shalt.err (!%p2185_p9)
}
  0x32   :  { %s2222_s0 = smov 256   ;;  %s2223_s15 = smov 16  }
  0x33   :  { %46 = dma.hbm_to_vmem [thread:$0]  %s2320_s2, 8192, %s41_s11, [#allocation6], %s2222_s0, %s2222_s0, %s2223_s15  }
  0x34   :  { %2211 = dma.done.wait [#allocation3], 256  }
  0x35   :  { %2212 = vsyncadd [#allocation3], 4294967040 }
  0x36   :  { %2213 = dma.done.wait [#allocation6], 24576  }
  0x37   :  { %2214 = vsyncadd [#allocation6], 4294942720  ;;  %v1800_v0 = vld [vmem:[#allocation5 + $0x4] ss:$8 sps:$4 sm:$0xff]   ;;  %v1802_v1 = vld [vmem:[#allocation5] ss:$8 sps:$4 sm:$0xff]  }
  0x38   :  { %460 = vmatprep.subr.bf16.mxu1 %v1800_v0  ;;  %v1803_v2 = vld [vmem:[#allocation5 + $0x14] ss:$8 sps:$4 sm:$0xff]   ;;  %v1812_v3 = vld [vmem:[#allocation5 + $0x204] ss:$8 sps:$4 sm:$0xff]   ;;  %v1814_v4 = vld [vmem:[#allocation5 + $0x200] ss:$8 sps:$4 sm:$0xff]  }
  0x39   :  { %461 = vmatpush1.bf16.xpose.msra.mxu1 %v1802_v1  ;;  %v1805_v5 = vld [vmem:[#allocation5 + $0x10] ss:$8 sps:$4 sm:$0xff]   ;;  %v1806_v6 = vld [vmem:[#allocation5 + $0x24] ss:$8 sps:$4 sm:$0xff]   ;;  %931 = vmatprep.subr.bf16.mxu0 %v1812_v3  ;;  %v1818_v7 = vld [vmem:[#allocation5 + $0x214] ss:$8 sps:$4 sm:$0xff]  }
  0x3a   :  { %462 = vmatprep.subr.bf16.mxu1 %v1803_v2  ;;  %932 = vmatpush1.bf16.xpose.msra.mxu0 %v1814_v4  ;;  %v1820_v8 = vld [vmem:[#allocation5 + $0x210] ss:$8 sps:$4 sm:$0xff]   ;;  %v1824_v9 = vld [vmem:[#allocation5 + $0x224] ss:$8 sps:$4 sm:$0xff]   ;;  %v1808_v10 = vld [vmem:[#allocation5 + $0x20] ss:$8 sps:$4 sm:$0xff]  }
  0x3b   :  { %933 = vmatprep.subr.bf16.mxu0 %v1818_v7  ;;  %v1809_v11 = vld [vmem:[#allocation5 + $0x34] ss:$8 sps:$4 sm:$0xff]   ;;  %v1826_v12 = vld [vmem:[#allocation5 + $0x220] ss:$8 sps:$4 sm:$0xff]   ;;  %v1811_v14 = vld [vmem:[#allocation5 + $0x30] ss:$8 sps:$4 sm:$0xff]  }
  0x3c   :  { %v1830_v13 = vld [vmem:[#allocation5 + $0x234] ss:$8 sps:$4 sm:$0xff]   ;;  %v1815_v15 = vld [vmem:[#allocation5 + $0x44] ss:$8 sps:$4 sm:$0xff]   ;;  %v1832_v16 = vld [vmem:[#allocation5 + $0x230] ss:$8 sps:$4 sm:$0xff]  }
  0x3d   :  { %v1836_v17 = vld [vmem:[#allocation5 + $0x244] ss:$8 sps:$4 sm:$0xff]   ;;  %v1817_v18 = vld [vmem:[#allocation5 + $0x40] ss:$8 sps:$4 sm:$0xff]   ;;  %v1821_v19 = vld [vmem:[#allocation5 + $0x54] ss:$8 sps:$4 sm:$0xff]  }
  0x3e   :  { %v1838_v20 = vld [vmem:[#allocation5 + $0x240] ss:$8 sps:$4 sm:$0xff]   ;;  %v1842_v21 = vld [vmem:[#allocation5 + $0x254] ss:$8 sps:$4 sm:$0xff]   ;;  %v1823_v22 = vld [vmem:[#allocation5 + $0x50] ss:$8 sps:$4 sm:$0xff]  }
  0x3f   :  { %v2291_v23 = vld [vmem:[#allocation2 + $0x4] ss:$8 sps:$4 sm:$0xff]   ;;  %v1827_v24 = vld [vmem:[#allocation5 + $0x64] ss:$8 sps:$4 sm:$0xff]   ;;  %v1844_v25 = vld [vmem:[#allocation5 + $0x250] ss:$8 sps:$4 sm:$0xff]  }
  0x40   :  { %492 = vmatprep.mubr.bf16.mxu1 %v2291_v23  ;;  %963 = vmatprep.mubr.bf16.mxu0 %v2291_v23  ;;  %v1848_v26 = vld [vmem:[#allocation5 + $0x264] ss:$8 sps:$4 sm:$0xff]   ;;  %v1829_v27 = vld [vmem:[#allocation5 + $0x60] ss:$8 sps:$4 sm:$0xff]   ;;  %v1833_v28 = vld [vmem:[#allocation5 + $0x74] ss:$8 sps:$4 sm:$0xff]  }
  0x41   :  { %463 = vmatpush1.bf16.xpose.msra.mxu1 %v1805_v5  ;;  %v1835_v29 = vld [vmem:[#allocation5 + $0x70] ss:$8 sps:$4 sm:$0xff]   ;;  %v1850_v30 = vld [vmem:[#allocation5 + $0x260] ss:$8 sps:$4 sm:$0xff]   ;;  %v1839_v31 = vld [vmem:[#allocation5 + $0x84] ss:$8 sps:$4 sm:$0xff]  }
  0x42   :  { %464 = vmatprep.subr.bf16.mxu1 %v1806_v6  ;;  %934 = vmatpush1.bf16.xpose.msra.mxu0 %v1820_v8  ;;  %v1854_v32 = vld [vmem:[#allocation5 + $0x274] ss:$8 sps:$4 sm:$0xff]   ;;  %v1856_v33 = vld [vmem:[#allocation5 + $0x270] ss:$8 sps:$4 sm:$0xff]   ;;  %v1860_v34 = vld [vmem:[#allocation5 + $0x284] ss:$8 sps:$4 sm:$0xff]  }
  0x43   :  { %935 = vmatprep.subr.bf16.mxu0 %v1824_v9  ;;  %v1841_v35 = vld [vmem:[#allocation5 + $0x80] ss:$8 sps:$4 sm:$0xff]   ;;  %v1845_v36 = vld [vmem:[#allocation5 + $0x94] ss:$8 sps:$4 sm:$0xff]   ;;  %v1847_v39 = vld [vmem:[#allocation5 + $0x90] ss:$8 sps:$4 sm:$0xff]  }
  0x44   :  { %v1862_v37 = vld [vmem:[#allocation5 + $0x280] ss:$8 sps:$4 sm:$0xff]   ;;  %v1866_v38 = vld [vmem:[#allocation5 + $0x294] ss:$8 sps:$4 sm:$0xff]   ;;  %v1851_v40 = vld [vmem:[#allocation5 + $0xa4] ss:$8 sps:$4 sm:$0xff]  }
  0x45   :  { %v1868_v41 = vld [vmem:[#allocation5 + $0x290] ss:$8 sps:$4 sm:$0xff]   ;;  %v1872_v42 = vld [vmem:[#allocation5 + $0x2a4] ss:$8 sps:$4 sm:$0xff]   ;;  %v1853_v43 = vld [vmem:[#allocation5 + $0xa0] ss:$8 sps:$4 sm:$0xff]  }
  0x46   :  { %v1857_v44 = vld [vmem:[#allocation5 + $0xb4] ss:$8 sps:$4 sm:$0xff]   ;;  %v1874_v45 = vld [vmem:[#allocation5 + $0x2a0] ss:$8 sps:$4 sm:$0xff]   ;;  %v1859_v47 = vld [vmem:[#allocation5 + $0xb0] ss:$8 sps:$4 sm:$0xff]  }
  0x47   :  { %v1878_v46 = vld [vmem:[#allocation5 + $0x2b4] ss:$8 sps:$4 sm:$0xff]   ;;  %v1863_v48 = vld [vmem:[#allocation5 + $0xc4] ss:$8 sps:$4 sm:$0xff]   ;;  %v1880_v49 = vld [vmem:[#allocation5 + $0x2b0] ss:$8 sps:$4 sm:$0xff]  }
  0x48   :  { %v1884_v50 = vld [vmem:[#allocation5 + $0x2c4] ss:$8 sps:$4 sm:$0xff]   ;;  %v1865_v51 = vld [vmem:[#allocation5 + $0xc0] ss:$8 sps:$4 sm:$0xff]   ;;  %v1869_v52 = vld [vmem:[#allocation5 + $0xd4] ss:$8 sps:$4 sm:$0xff]  }
  0x49   :  { %465 = vmatpush1.bf16.xpose.msra.mxu1 %v1808_v10  ;;  %v1886_v53 = vld [vmem:[#allocation5 + $0x2c0] ss:$8 sps:$4 sm:$0xff]   ;;  %v1893_v54 = vld [vmem:[#allocation5 + $0x2d4] ss:$8 sps:$4 sm:$0xff]   ;;  %v1871_v55 = vld [vmem:[#allocation5 + $0xd0] ss:$8 sps:$4 sm:$0xff]  }
  0x4a   :  { %466 = vmatprep.subr.bf16.mxu1 %v1809_v11  ;;  %936 = vmatpush1.bf16.xpose.msra.mxu0 %v1826_v12  ;;  %v1875_v56 = vld [vmem:[#allocation5 + $0xe4] ss:$8 sps:$4 sm:$0xff]   ;;  %v1895_v57 = vld [vmem:[#allocation5 + $0x2d0] ss:$8 sps:$4 sm:$0xff]   ;;  %v1877_v59 = vld [vmem:[#allocation5 + $0xe0] ss:$8 sps:$4 sm:$0xff]  }
  0x4b   :  { %937 = vmatprep.subr.bf16.mxu0 %v1830_v13  ;;  %v1899_v58 = vld [vmem:[#allocation5 + $0x2e4] ss:$8 sps:$4 sm:$0xff]   ;;  %v1881_v60 = vld [vmem:[#allocation5 + $0xf4] ss:$8 sps:$4 sm:$0xff]   ;;  %v1901_v61 = vld [vmem:[#allocation5 + $0x2e0] ss:$8 sps:$4 sm:$0xff]  }
  0x4c   :  { %v1905_v62 = vld [vmem:[#allocation5 + $0x2f4] ss:$8 sps:$4 sm:$0xff]   ;;  %v1883_v63 = vld [vmem:[#allocation5 + $0xf0] ss:$8 sps:$4 sm:$0xff]   ;;  %v1892_v0 = vld [vmem:[#allocation5 + $0x104] ss:$8 sps:$4 sm:$0xff]  }
  0x4d   :  { %v1907_v1 = vld [vmem:[#allocation5 + $0x2f0] ss:$8 sps:$4 sm:$0xff]   ;;  %v1949_v3 = vld [vmem:[#allocation7 + $0x4] ss:$16 sps:$4 sm:$0xff]   ;;  %v1890_v4 = vld [vmem:[#allocation5 + $0x100] ss:$8 sps:$4 sm:$0xff]  }
  0x4e   :  { %v2295_v2 = vld [vmem:[#allocation2] ss:$8 sps:$4 sm:$0xff]   ;;  %v1898_v5 = vld [vmem:[#allocation5 + $0x114] ss:$8 sps:$4 sm:$0xff]   ;;  %v1904_v9 = vld [vmem:[#allocation5 + $0x124] ss:$8 sps:$4 sm:$0xff]  }
  0x4f   :  { %v1947_v6 = vld [vmem:[#allocation7] ss:$16 sps:$4 sm:$0xff]   ;;  %v1955_v7 = vld [vmem:[#allocation7 + $0x24] ss:$16 sps:$4 sm:$0xff]   ;;  %s2224_s2 = smov [#allocation8]  }
  0x50   :  { %v1896_v8 = vld [vmem:[#allocation5 + $0x110] ss:$8 sps:$4 sm:$0xff]   ;;  %v1961_v11 = vld [vmem:[#allocation7 + $0x44] ss:$16 sps:$4 sm:$0xff]   ;;  %v1902_v12 = vld [vmem:[#allocation5 + $0x120] ss:$8 sps:$4 sm:$0xff]  }
  0x51   :  { %467 = vmatpush1.bf16.xpose.msra.mxu1 %v1811_v14  ;;  %v1953_v10 = vld [vmem:[#allocation7 + $0x20] ss:$16 sps:$4 sm:$0xff]   ;;  %v1910_v13 = vld [vmem:[#allocation5 + $0x134] ss:$8 sps:$4 sm:$0xff]   ;;  %s1572_s23 = sshll.u32 %s2224_s2, 4  ;;  %s1573_s23 = int_to_ptr.vmem [resolvable:$true] %s1572_s23 }
  0x52   :  { %468 = vmatprep.subr.bf16.mxu1 %v1815_v15  ;;  %938 = vmatpush1.bf16.xpose.msra.mxu0 %v1832_v16  ;;  %v1959_v14 = vld [vmem:[#allocation7 + $0x40] ss:$16 sps:$4 sm:$0xff]   ;;  %v1967_v15 = vld [vmem:[#allocation7 + $0x64] ss:$16 sps:$4 sm:$0xff]   ;;  %s2189_s24 = scalar_lea.vmem %s1573_s23, 512  ;;  %p2194_p11 = scmp.lt.s32.totalorder %s1573_s23, %s1573_s23 }
  0x53   :  { %939 = vmatprep.subr.bf16.mxu0 %v1836_v17  ;;  %v1908_v16 = vld [vmem:[#allocation5 + $0x130] ss:$8 sps:$4 sm:$0xff]   ;;  %v1913_v17 = vld [vmem:[#allocation5 + $0x144] ss:$8 sps:$4 sm:$0xff]   ;;  %p2190_p10 = scmp.ne.s32.totalorder %s1573_s23, %s2189_s24  ;;  %p2195_p12 = scmp.lt.s32.totalorder %s2189_s24, %s2189_s24 }
  0x55   :  { %p2196_p13 = por %p2195_p12, %p2194_p11 }
  0x57   :  { %p2197_p0 = pnand %p2196_p13, %p2190_p10 }
  0x59   :  { %469 = vmatpush1.bf16.xpose.msra.mxu1 %v1817_v18  ;;  %v1965_v18 = vld [vmem:[#allocation7 + $0x60] ss:$16 sps:$4 sm:$0xff]  }
  0x5a   :  { %470 = vmatprep.subr.bf16.mxu1 %v1821_v19  ;;  %940 = vmatpush1.bf16.xpose.msra.mxu0 %v1838_v20  ;;  %v1973_v19 = vld [vmem:[#allocation7 + $0x84] ss:$16 sps:$4 sm:$0xff]   ;;  %v1911_v20 = vld [vmem:[#allocation5 + $0x140] ss:$8 sps:$4 sm:$0xff]  }
  0x5b   :  { %941 = vmatprep.subr.bf16.mxu0 %v1842_v21  ;;  %v1916_v21 = vld [vmem:[#allocation5 + $0x154] ss:$8 sps:$4 sm:$0xff]  }
  0x61   :  { %471 = vmatpush1.bf16.xpose.msra.mxu1 %v1823_v22  ;;  %v1971_v22 = vld [vmem:[#allocation7 + $0x80] ss:$16 sps:$4 sm:$0xff]  }
  0x62   :  { %472 = vmatprep.subr.bf16.mxu1 %v1827_v24  ;;  %942 = vmatpush1.bf16.xpose.msra.mxu0 %v1844_v25  ;;  %v1979_v24 = vld [vmem:[#allocation7 + $0xa4] ss:$16 sps:$4 sm:$0xff]   ;;  %v1914_v25 = vld [vmem:[#allocation5 + $0x150] ss:$8 sps:$4 sm:$0xff]  }
  0x63   :  { %943 = vmatprep.subr.bf16.mxu0 %v1848_v26  ;;  %v1919_v26 = vld [vmem:[#allocation5 + $0x164] ss:$8 sps:$4 sm:$0xff]  }
  0x69   :  { %473 = vmatpush1.bf16.xpose.msra.mxu1 %v1829_v27  ;;  %v1977_v27 = vld [vmem:[#allocation7 + $0xa0] ss:$16 sps:$4 sm:$0xff]  }
  0x6a   :  { %474 = vmatprep.subr.bf16.mxu1 %v1833_v28  ;;  %944 = vmatpush1.bf16.xpose.msra.mxu0 %v1850_v30  ;;  %v1985_v28 = vld [vmem:[#allocation7 + $0xc4] ss:$16 sps:$4 sm:$0xff]  }
  0x6b   :  { %945 = vmatprep.subr.bf16.mxu0 %v1854_v32  ;;  %v1922_v30 = vld [vmem:[#allocation5 + $0x174] ss:$8 sps:$4 sm:$0xff]  }
  0x6c   :  { %v1991_v32 = vld [vmem:[#allocation7 + $0xe4] ss:$16 sps:$4 sm:$0xff]  }
  0x71   :  { %475 = vmatpush1.bf16.xpose.msra.mxu1 %v1835_v29  ;;  %v1917_v29 = vld [vmem:[#allocation5 + $0x160] ss:$8 sps:$4 sm:$0xff]  }
  0x72   :  { %476 = vmatprep.subr.bf16.mxu1 %v1839_v31  ;;  %946 = vmatpush1.bf16.xpose.msra.mxu0 %v1856_v33  ;;  %v1983_v31 = vld [vmem:[#allocation7 + $0xc0] ss:$16 sps:$4 sm:$0xff]  }
  0x73   :  { %947 = vmatprep.subr.bf16.mxu0 %v1860_v34  ;;  %v1920_v33 = vld [vmem:[#allocation5 + $0x170] ss:$8 sps:$4 sm:$0xff]   ;;  %v1925_v34 = vld [vmem:[#allocation5 + $0x184] ss:$8 sps:$4 sm:$0xff]  }
  0x79   :  { %477 = vmatpush1.bf16.xpose.msra.mxu1 %v1841_v35  ;;  %v1989_v35 = vld [vmem:[#allocation7 + $0xe0] ss:$16 sps:$4 sm:$0xff]  }
  0x7a   :  { %478 = vmatprep.subr.bf16.mxu1 %v1845_v36  ;;  %948 = vmatpush1.bf16.xpose.msra.mxu0 %v1862_v37  ;;  %v1997_v36 = vld [vmem:[#allocation7 + $0x104] ss:$16 sps:$4 sm:$0xff]   ;;  %v1923_v37 = vld [vmem:[#allocation5 + $0x180] ss:$8 sps:$4 sm:$0xff]  }
  0x7b   :  { %949 = vmatprep.subr.bf16.mxu0 %v1866_v38  ;;  %v1928_v38 = vld [vmem:[#allocation5 + $0x194] ss:$8 sps:$4 sm:$0xff]  }
  0x81   :  { %479 = vmatpush1.bf16.xpose.msra.mxu1 %v1847_v39  ;;  %v1995_v39 = vld [vmem:[#allocation7 + $0x100] ss:$16 sps:$4 sm:$0xff]  }
  0x82   :  { %480 = vmatprep.subr.bf16.mxu1 %v1851_v40  ;;  %950 = vmatpush1.bf16.xpose.msra.mxu0 %v1868_v41  ;;  %v2003_v40 = vld [vmem:[#allocation7 + $0x124] ss:$16 sps:$4 sm:$0xff]   ;;  %v1926_v41 = vld [vmem:[#allocation5 + $0x190] ss:$8 sps:$4 sm:$0xff]  }
  0x83   :  { %951 = vmatprep.subr.bf16.mxu0 %v1872_v42  ;;  %v1931_v42 = vld [vmem:[#allocation5 + $0x1a4] ss:$8 sps:$4 sm:$0xff]  }
  0x89   :  { %481 = vmatpush1.bf16.xpose.msra.mxu1 %v1853_v43  ;;  %v2001_v43 = vld [vmem:[#allocation7 + $0x120] ss:$16 sps:$4 sm:$0xff]  }
  0x8a   :  { %482 = vmatprep.subr.bf16.mxu1 %v1857_v44  ;;  %952 = vmatpush1.bf16.xpose.msra.mxu0 %v1874_v45  ;;  %v2009_v44 = vld [vmem:[#allocation7 + $0x144] ss:$16 sps:$4 sm:$0xff]   ;;  %v1929_v45 = vld [vmem:[#allocation5 + $0x1a0] ss:$8 sps:$4 sm:$0xff]  }
  0x8b   :  { %953 = vmatprep.subr.bf16.mxu0 %v1878_v46  ;;  %v1934_v46 = vld [vmem:[#allocation5 + $0x1b4] ss:$8 sps:$4 sm:$0xff]  }
  0x91   :  { %483 = vmatpush1.bf16.xpose.msra.mxu1 %v1859_v47  ;;  %v2007_v47 = vld [vmem:[#allocation7 + $0x140] ss:$16 sps:$4 sm:$0xff]  }
  0x92   :  { %484 = vmatprep.subr.bf16.mxu1 %v1863_v48  ;;  %954 = vmatpush1.bf16.xpose.msra.mxu0 %v1880_v49  ;;  %v2015_v48 = vld [vmem:[#allocation7 + $0x164] ss:$16 sps:$4 sm:$0xff]   ;;  %v1932_v49 = vld [vmem:[#allocation5 + $0x1b0] ss:$8 sps:$4 sm:$0xff]  }
  0x93   :  { %955 = vmatprep.subr.bf16.mxu0 %v1884_v50  ;;  %v1937_v50 = vld [vmem:[#allocation5 + $0x1c4] ss:$8 sps:$4 sm:$0xff]  }
  0x99   :  { %485 = vmatpush1.bf16.xpose.msra.mxu1 %v1865_v51  ;;  %v2013_v51 = vld [vmem:[#allocation7 + $0x160] ss:$16 sps:$4 sm:$0xff]  }
  0x9a   :  { %486 = vmatprep.subr.bf16.mxu1 %v1869_v52  ;;  %956 = vmatpush1.bf16.xpose.msra.mxu0 %v1886_v53  ;;  %v2021_v52 = vld [vmem:[#allocation7 + $0x184] ss:$16 sps:$4 sm:$0xff]   ;;  %v1935_v53 = vld [vmem:[#allocation5 + $0x1c0] ss:$8 sps:$4 sm:$0xff]  }
  0x9b   :  { %957 = vmatprep.subr.bf16.mxu0 %v1893_v54  ;;  %v1940_v54 = vld [vmem:[#allocation5 + $0x1d4] ss:$8 sps:$4 sm:$0xff]  }
  0xa1   :  { %487 = vmatpush1.bf16.xpose.msra.mxu1 %v1871_v55  ;;  %v2019_v55 = vld [vmem:[#allocation7 + $0x180] ss:$16 sps:$4 sm:$0xff]  }
  0xa2   :  { %488 = vmatprep.subr.bf16.mxu1 %v1875_v56  ;;  %958 = vmatpush1.bf16.xpose.msra.mxu0 %v1895_v57  ;;  %v2027_v56 = vld [vmem:[#allocation7 + $0x1a4] ss:$16 sps:$4 sm:$0xff]   ;;  %v1938_v57 = vld [vmem:[#allocation5 + $0x1d0] ss:$8 sps:$4 sm:$0xff]  }
  0xa3   :  { %959 = vmatprep.subr.bf16.mxu0 %v1899_v58  ;;  %v1943_v58 = vld [vmem:[#allocation5 + $0x1e4] ss:$8 sps:$4 sm:$0xff]  }
  0xa9   :  { %489 = vmatpush1.bf16.xpose.msra.mxu1 %v1877_v59  ;;  %v2025_v59 = vld [vmem:[#allocation7 + $0x1a0] ss:$16 sps:$4 sm:$0xff]  }
  0xaa   :  { %490 = vmatprep.subr.bf16.mxu1 %v1881_v60  ;;  %960 = vmatpush1.bf16.xpose.msra.mxu0 %v1901_v61  ;;  %v2033_v60 = vld [vmem:[#allocation7 + $0x1c4] ss:$16 sps:$4 sm:$0xff]   ;;  %v1941_v61 = vld [vmem:[#allocation5 + $0x1e0] ss:$8 sps:$4 sm:$0xff]  }
  0xab   :  { %961 = vmatprep.subr.bf16.mxu0 %v1905_v62  ;;  %v1946_v62 = vld [vmem:[#allocation5 + $0x1f4] ss:$8 sps:$4 sm:$0xff]  }
  0xb1   :  { %491 = vmatpush1.bf16.xpose.msra.mxu1 %v1883_v63  ;;  %v2031_v63 = vld [vmem:[#allocation7 + $0x1c0] ss:$16 sps:$4 sm:$0xff]  }
  0xb2   :  { %503 = vmatprep.subr.bf16.mxu1 %v1892_v0  ;;  %962 = vmatpush1.bf16.xpose.msra.mxu0 %v1907_v1  ;;  %v2039_v0 = vld [vmem:[#allocation7 + $0x1e4] ss:$16 sps:$4 sm:$0xff]   ;;  %v1944_v1 = vld [vmem:[#allocation5 + $0x1f0] ss:$8 sps:$4 sm:$0xff]  }
  0xb3   :  { %1473 = vmatprep.subr.bf16.mxu0 %v1949_v3  ;;  %v1952_v3 = vld [vmem:[#allocation5 + $0x304] ss:$8 sps:$4 sm:$0xff]  }
  0xb8   :  { %493 = vmatmul.mubr.bf16.vlgmr.msra.gmra.mrb[0].mxu1 %v2295_v2 }
  0xb9   :  { %504 = vmatpush1.bf16.xpose.msra.mxu1 %v1890_v4  ;;  %535 = vmatprep.mubr.bf16.mxu1 %v2291_v23  ;;  %v2037_v4 = vld [vmem:[#allocation7 + $0x1e0] ss:$16 sps:$4 sm:$0xff]  }
  0xba   :  { %505 = vmatprep.subr.bf16.mxu1 %v1898_v5  ;;  %964 = vmatmul.mubr.bf16.vlgmr.msra.gmra.mrb[0].mxu0 %v2295_v2  ;;  %v1950_v5 = vld [vmem:[#allocation5 + $0x300] ss:$8 sps:$4 sm:$0xff]  }
  0xbb   :  { %1474 = vmatpush1.bf16.xpose.msra.mxu0 %v1947_v6  ;;  %v1958_v6 = vld [vmem:[#allocation5 + $0x314] ss:$8 sps:$4 sm:$0xff]  }
  0xbc   :  { %1475 = vmatprep.subr.bf16.mxu0 %v1955_v7  ;;  %v1956_v7 = vld [vmem:[#allocation5 + $0x310] ss:$8 sps:$4 sm:$0xff]  }
  0xc1   :  { %506 = vmatpush1.bf16.xpose.msra.mxu1 %v1896_v8  ;;  %v1964_v8 = vld [vmem:[#allocation5 + $0x324] ss:$8 sps:$4 sm:$0xff]  }
  0xc2   :  { %507 = vmatprep.subr.bf16.mxu1 %v1904_v9  ;;  %v1962_v9 = vld [vmem:[#allocation5 + $0x320] ss:$8 sps:$4 sm:$0xff]  }
  0xc3   :  { %1476 = vmatpush1.bf16.xpose.msra.mxu0 %v1953_v10  ;;  %v1970_v10 = vld [vmem:[#allocation5 + $0x334] ss:$8 sps:$4 sm:$0xff]  }
  0xc4   :  { %1477 = vmatprep.subr.bf16.mxu0 %v1961_v11  ;;  %v1968_v11 = vld [vmem:[#allocation5 + $0x330] ss:$8 sps:$4 sm:$0xff]  }
  0xc9   :  { %508 = vmatpush1.bf16.xpose.msra.mxu1 %v1902_v12  ;;  %v1976_v12 = vld [vmem:[#allocation5 + $0x344] ss:$8 sps:$4 sm:$0xff]  }
  0xca   :  { %509 = vmatprep.subr.bf16.mxu1 %v1910_v13  ;;  %v1974_v13 = vld [vmem:[#allocation5 + $0x340] ss:$8 sps:$4 sm:$0xff]  }
  0xcb   :  { %1478 = vmatpush1.bf16.xpose.msra.mxu0 %v1959_v14  ;;  %v1982_v14 = vld [vmem:[#allocation5 + $0x354] ss:$8 sps:$4 sm:$0xff]  }
  0xcc   :  { %1479 = vmatprep.subr.bf16.mxu0 %v1967_v15  ;;  %v1980_v15 = vld [vmem:[#allocation5 + $0x350] ss:$8 sps:$4 sm:$0xff]  }
  0xd1   :  { %510 = vmatpush1.bf16.xpose.msra.mxu1 %v1908_v16  ;;  %v1988_v16 = vld [vmem:[#allocation5 + $0x364] ss:$8 sps:$4 sm:$0xff]  }
  0xd2   :  { %511 = vmatprep.subr.bf16.mxu1 %v1913_v17  ;;  %v1994_v17 = vld [vmem:[#allocation5 + $0x374] ss:$8 sps:$4 sm:$0xff]  }
  0xd3   :  { %1480 = vmatpush1.bf16.xpose.msra.mxu0 %v1965_v18  ;;  %v1992_v18 = vld [vmem:[#allocation5 + $0x370] ss:$8 sps:$4 sm:$0xff]  }
  0xd4   :  { %1481 = vmatprep.subr.bf16.mxu0 %v1973_v19  ;;  %v2000_v19 = vld [vmem:[#allocation5 + $0x384] ss:$8 sps:$4 sm:$0xff]  }
  0xd9   :  { %512 = vmatpush1.bf16.xpose.msra.mxu1 %v1911_v20  ;;  %v1998_v20 = vld [vmem:[#allocation5 + $0x380] ss:$8 sps:$4 sm:$0xff]  }
  0xda   :  { %513 = vmatprep.subr.bf16.mxu1 %v1916_v21  ;;  %v2006_v21 = vld [vmem:[#allocation5 + $0x394] ss:$8 sps:$4 sm:$0xff]  }
  0xdb   :  { %1482 = vmatpush1.bf16.xpose.msra.mxu0 %v1971_v22  ;;  %v2004_v22 = vld [vmem:[#allocation5 + $0x390] ss:$8 sps:$4 sm:$0xff]  }
  0xdc   :  { %1483 = vmatprep.subr.bf16.mxu0 %v1979_v24  ;;  %v2012_v24 = vld [vmem:[#allocation5 + $0x3a4] ss:$8 sps:$4 sm:$0xff]  }
  0xe1   :  { %514 = vmatpush1.bf16.xpose.msra.mxu1 %v1914_v25  ;;  %v2010_v25 = vld [vmem:[#allocation5 + $0x3a0] ss:$8 sps:$4 sm:$0xff]  }
  0xe2   :  { %515 = vmatprep.subr.bf16.mxu1 %v1919_v26  ;;  %v2018_v26 = vld [vmem:[#allocation5 + $0x3b4] ss:$8 sps:$4 sm:$0xff]  }
  0xe3   :  { %1484 = vmatpush1.bf16.xpose.msra.mxu0 %v1977_v27 }
  0xe4   :  { %1485 = vmatprep.subr.bf16.mxu0 %v1985_v28 }
  0xe9   :  { %516 = vmatpush1.bf16.xpose.msra.mxu1 %v1917_v29 }
  0xea   :  { %517 = vmatprep.subr.bf16.mxu1 %v1922_v30 }
  0xeb   :  { %1486 = vmatpush1.bf16.xpose.msra.mxu0 %v1983_v31 }
  0xec   :  { %1487 = vmatprep.subr.bf16.mxu0 %v1991_v32  ;;  %v2016_v32 = vld [vmem:[#allocation5 + $0x3b0] ss:$8 sps:$4 sm:$0xff]  }
  0xf1   :  { %518 = vmatpush1.bf16.xpose.msra.mxu1 %v1920_v33 }
  0xf2   :  { %519 = vmatprep.subr.bf16.mxu1 %v1925_v34 }
  0xf3   :  { %1488 = vmatpush1.bf16.xpose.msra.mxu0 %v1989_v35  ;;  %v2024_v35 = vld [vmem:[#allocation5 + $0x3c4] ss:$8 sps:$4 sm:$0xff]  }
  0xf4   :  { %1489 = vmatprep.subr.bf16.mxu0 %v1997_v36 }
  0xf9   :  { %520 = vmatpush1.bf16.xpose.msra.mxu1 %v1923_v37 }
  0xfa   :  { %521 = vmatprep.subr.bf16.mxu1 %v1928_v38 }
  0xfb   :  { %1490 = vmatpush1.bf16.xpose.msra.mxu0 %v1995_v39  ;;  %v2045_v39 = vld [vmem:[#allocation7 + $0xc] ss:$16 sps:$4 sm:$0xff]  }
  0xfc   :  { %1491 = vmatprep.subr.bf16.mxu0 %v2003_v40 }
 0x101   :  { %522 = vmatpush1.bf16.xpose.msra.mxu1 %v1926_v41 }
 0x102   :  { %523 = vmatprep.subr.bf16.mxu1 %v1931_v42  ;;  %v2022_v42 = vld [vmem:[#allocation5 + $0x3c0] ss:$8 sps:$4 sm:$0xff]  }
 0x103   :  { %1492 = vmatpush1.bf16.xpose.msra.mxu0 %v2001_v43  ;;  %v2030_v43 = vld [vmem:[#allocation5 + $0x3d4] ss:$8 sps:$4 sm:$0xff]  }
 0x104   :  { %1493 = vmatprep.subr.bf16.mxu0 %v2009_v44 }
 0x109   :  { %524 = vmatpush1.bf16.xpose.msra.mxu1 %v1929_v45 }
 0x10a   :  { %525 = vmatprep.subr.bf16.mxu1 %v1934_v46 }
 0x10b   :  { %1494 = vmatpush1.bf16.xpose.msra.mxu0 %v2007_v47 }
 0x10c   :  { %1495 = vmatprep.subr.bf16.mxu0 %v2015_v48 }
 0x111   :  { %526 = vmatpush1.bf16.xpose.msra.mxu1 %v1932_v49 }
 0x112   :  { %527 = vmatprep.subr.bf16.mxu1 %v1937_v50 }
 0x113   :  { %1496 = vmatpush1.bf16.xpose.msra.mxu0 %v2013_v51 }
 0x114   :  { %1497 = vmatprep.subr.bf16.mxu0 %v2021_v52  ;;  %v2028_v52 = vld [vmem:[#allocation5 + $0x3d0] ss:$8 sps:$4 sm:$0xff]  }
 0x119   :  { %528 = vmatpush1.bf16.xpose.msra.mxu1 %v1935_v53  ;;  %v2036_v53 = vld [vmem:[#allocation5 + $0x3e4] ss:$8 sps:$4 sm:$0xff]  }
 0x11a   :  { %529 = vmatprep.subr.bf16.mxu1 %v1940_v54 }
 0x11b   :  { %1498 = vmatpush1.bf16.xpose.msra.mxu0 %v2019_v55  ;;  %v2034_v55 = vld [vmem:[#allocation5 + $0x3e0] ss:$8 sps:$4 sm:$0xff]  }
 0x11c   :  { %1499 = vmatprep.subr.bf16.mxu0 %v2027_v56 }
 0x121   :  { %530 = vmatpush1.bf16.xpose.msra.mxu1 %v1938_v57 }
 0x122   :  { %531 = vmatprep.subr.bf16.mxu1 %v1943_v58  ;;  %v2042_v58 = vld [vmem:[#allocation5 + $0x3f4] ss:$8 sps:$4 sm:$0xff]  }
 0x123   :  { %1500 = vmatpush1.bf16.xpose.msra.mxu0 %v2025_v59 }
 0x124   :  { %1501 = vmatprep.subr.bf16.mxu0 %v2033_v60 }
 0x129   :  { %532 = vmatpush1.bf16.xpose.msra.mxu1 %v1941_v61 }
 0x12a   :  { %533 = vmatprep.subr.bf16.mxu1 %v1946_v62 }
 0x12b   :  { %1502 = vmatpush1.bf16.xpose.msra.mxu0 %v2031_v63 }
 0x12c   :  { %1503 = vmatprep.subr.bf16.mxu0 %v2039_v0 }
 0x131   :  { %534 = vmatpush1.bf16.xpose.msra.mxu1 %v1944_v1 }
 0x132   :  { %974 = vmatprep.subr.bf16.mxu1 %v1952_v3 }
 0x133   :  { %1504 = vmatpush1.bf16.xpose.msra.mxu0 %v2037_v4 }
 0x134   :  { %1516 = vmatprep.subr.bf16.mxu0 %v2045_v39  ;;  %v2085_v39 = vld [vmem:[#allocation7 + $0x1c8] ss:$16 sps:$4 sm:$0xff]  }
 0x138   :  { %536 = vmatmul.mubr.bf16.vlgmr.msra.gmra.mrb[4].mxu1 %v2295_v2 }
 0x139   :  { %975 = vmatpush1.bf16.xpose.msra.mxu1 %v1950_v5  ;;  %1006 = vmatprep.mubr.bf16.mxu1 %v2291_v23  ;;  %v1986_v23 = vld [vmem:[#allocation5 + $0x360] ss:$8 sps:$4 sm:$0xff]  }
 0x13a   :  { %976 = vmatprep.subr.bf16.mxu1 %v1958_v6 }
 0x141   :  { %977 = vmatpush1.bf16.xpose.msra.mxu1 %v1956_v7  ;;  %v2040_v7 = vld [vmem:[#allocation5 + $0x3f0] ss:$8 sps:$4 sm:$0xff]  }
 0x142   :  { %978 = vmatprep.subr.bf16.mxu1 %v1964_v8  ;;  %v2043_v8 = vld [vmem:[#allocation7 + $0x8] ss:$16 sps:$4 sm:$0xff]  }
 0x149   :  { %979 = vmatpush1.bf16.xpose.msra.mxu1 %v1962_v9  ;;  %v2048_v9 = vld [vmem:[#allocation7 + $0x2c] ss:$16 sps:$4 sm:$0xff]  }
 0x14a   :  { %980 = vmatprep.subr.bf16.mxu1 %v1970_v10  ;;  %v2046_v10 = vld [vmem:[#allocation7 + $0x28] ss:$16 sps:$4 sm:$0xff]  }
 0x151   :  { %981 = vmatpush1.bf16.xpose.msra.mxu1 %v1968_v11  ;;  %v2051_v11 = vld [vmem:[#allocation7 + $0x4c] ss:$16 sps:$4 sm:$0xff]  }
 0x152   :  { %982 = vmatprep.subr.bf16.mxu1 %v1976_v12  ;;  %v2049_v12 = vld [vmem:[#allocation7 + $0x48] ss:$16 sps:$4 sm:$0xff]  }
 0x159   :  { %983 = vmatpush1.bf16.xpose.msra.mxu1 %v1974_v13  ;;  %v2054_v13 = vld [vmem:[#allocation7 + $0x6c] ss:$16 sps:$4 sm:$0xff]  }
 0x15a   :  { %984 = vmatprep.subr.bf16.mxu1 %v1982_v14  ;;  %v2052_v14 = vld [vmem:[#allocation7 + $0x68] ss:$16 sps:$4 sm:$0xff]  }
 0x161   :  { %985 = vmatpush1.bf16.xpose.msra.mxu1 %v1980_v15  ;;  %v2057_v15 = vld [vmem:[#allocation7 + $0x8c] ss:$16 sps:$4 sm:$0xff]  }
 0x162   :  { %986 = vmatprep.subr.bf16.mxu1 %v1988_v16  ;;  %v2055_v16 = vld [vmem:[#allocation7 + $0x88] ss:$16 sps:$4 sm:$0xff]  }
 0x169   :  { %987 = vmatpush1.bf16.xpose.msra.mxu1 %v1986_v23  ;;  %v2060_v23 = vld [vmem:[#allocation7 + $0xac] ss:$16 sps:$4 sm:$0xff]  }
 0x16a   :  { %988 = vmatprep.subr.bf16.mxu1 %v1994_v17  ;;  %v2058_v17 = vld [vmem:[#allocation7 + $0xa8] ss:$16 sps:$4 sm:$0xff]  }
 0x171   :  { %989 = vmatpush1.bf16.xpose.msra.mxu1 %v1992_v18  ;;  %v2063_v18 = vld [vmem:[#allocation7 + $0xcc] ss:$16 sps:$4 sm:$0xff]  }
 0x172   :  { %990 = vmatprep.subr.bf16.mxu1 %v2000_v19  ;;  %v2061_v19 = vld [vmem:[#allocation7 + $0xc8] ss:$16 sps:$4 sm:$0xff]  }
 0x179   :  { %991 = vmatpush1.bf16.xpose.msra.mxu1 %v1998_v20  ;;  %v2064_v20 = vld [vmem:[#allocation7 + $0xe8] ss:$16 sps:$4 sm:$0xff]  }
 0x17a   :  { %992 = vmatprep.subr.bf16.mxu1 %v2006_v21  ;;  %v2069_v21 = vld [vmem:[#allocation7 + $0x10c] ss:$16 sps:$4 sm:$0xff]  }
 0x181   :  { %993 = vmatpush1.bf16.xpose.msra.mxu1 %v2004_v22  ;;  %v2067_v22 = vld [vmem:[#allocation7 + $0x108] ss:$16 sps:$4 sm:$0xff]  }
 0x182   :  { %994 = vmatprep.subr.bf16.mxu1 %v2012_v24  ;;  %v2072_v24 = vld [vmem:[#allocation7 + $0x12c] ss:$16 sps:$4 sm:$0xff]  }
 0x189   :  { %995 = vmatpush1.bf16.xpose.msra.mxu1 %v2010_v25  ;;  %v2070_v25 = vld [vmem:[#allocation7 + $0x128] ss:$16 sps:$4 sm:$0xff]  }
 0x18a   :  { %996 = vmatprep.subr.bf16.mxu1 %v2018_v26  ;;  %v2075_v26 = vld [vmem:[#allocation7 + $0x14c] ss:$16 sps:$4 sm:$0xff]  }
 0x18b   :  { %v494_v27 = vpop.f32.mrb[0].mxu1 }
 0x18c   :  { %v1715_v28 = vmul.f32 -1.442695, %v494_v27  ;;  %v496_v29 = vpop.f32.mrb[1].mxu1 }
 0x18d   :  { %v1716_v30 = vmul.f32 -1.442695, %v496_v29  ;;  %v498_v31 = vpop.f32.mrb[2].mxu1  ;;  %v965_v37 = vpop.f32.mrb[0].mxu0 }
 0x18e   :  { %2091 = vpow2.f32 %v1715_v28  ;;  %v1719_v33 = vmul.f32 -1.442695, %v498_v31  ;;  %v500_v34 = vpop.f32.mrb[3].mxu1  ;;  %v967_v38 = vpop.f32.mrb[1].mxu0  ;;  %v2078_v28 = vld [vmem:[#allocation7 + $0x16c] ss:$16 sps:$4 sm:$0xff]  }
 0x18f   :  { %2093 = vpow2.f32 %v1716_v30  ;;  %v1720_v36 = vmul.f32 -1.442695, %v500_v34  ;;  %v969_v40 = vpop.f32.mrb[2].mxu0  ;;  %v2081_v30 = vld [vmem:[#allocation7 + $0x18c] ss:$16 sps:$4 sm:$0xff]  }
 0x190   :  { %2095 = vpow2.f32 %v1719_v33  ;;  %v971_v41 = vpop.f32.mrb[3].mxu0 }
 0x191   :  { %2097 = vpow2.f32 %v1720_v36  ;;  %997 = vmatpush1.bf16.xpose.msra.mxu1 %v2016_v32  ;;  %v2084_v36 = vld [vmem:[#allocation7 + $0x1ac] ss:$16 sps:$4 sm:$0xff]  }
 0x192   :  { %998 = vmatprep.subr.bf16.mxu1 %v2024_v35 }
 0x198   :  { %v2092_v44 = vpop.eup %2091 }
 0x199   :  { %v2094_v45 = vpop.eup %2093  ;;  %v1041_v46 = vadd.f32 1.0, %v2092_v44  ;;  %999 = vmatpush1.bf16.xpose.msra.mxu1 %v2022_v42 }
 0x19a   :  { %v2096_v47 = vpop.eup %2095  ;;  %v1042_v48 = vadd.f32 1.0, %v2094_v45  ;;  %1000 = vmatprep.subr.bf16.mxu1 %v2030_v43 }
 0x19b   :  { %v2098_v49 = vpop.eup %2097  ;;  %2099 = vrcp.f32 %v1041_v46  ;;  %v1045_v50 = vadd.f32 1.0, %v2096_v47 }
 0x19c   :  { %2101 = vrcp.f32 %v1042_v48  ;;  %v1046_v51 = vadd.f32 1.0, %v2098_v49 }
 0x19d   :  { %2103 = vrcp.f32 %v1045_v50 }
 0x19e   :  { %2105 = vrcp.f32 %v1046_v51 }
 0x1a1   :  { %1001 = vmatpush1.bf16.xpose.msra.mxu1 %v2028_v52 }
 0x1a2   :  { %1002 = vmatprep.subr.bf16.mxu1 %v2036_v53 }
 0x1a5   :  { %v2100_v54 = vpop.eup %2099 }
 0x1a6   :  { %v2102_v56 = vpop.eup %2101  ;;  %v1065_v57 = vmul.f32 %v2100_v54, %v494_v27  ;;  %v2073_v27 = vld [vmem:[#allocation7 + $0x148] ss:$16 sps:$4 sm:$0xff]  }
 0x1a7   :  { %v2104_v59 = vpop.eup %2103  ;;  %v1066_v60 = vmul.f32 %v2102_v56, %v496_v29  ;;  %v2076_v29 = vld [vmem:[#allocation7 + $0x168] ss:$16 sps:$4 sm:$0xff]  }
 0x1a8   :  { %v2106_v61 = vpop.eup %2105  ;;  %v1069_v62 = vmul.f32 %v2104_v59, %v498_v31  ;;  %v1073_v63 = vmul.f32 %v1065_v57, %v965_v37  ;;  %v2082_v37 = vld [vmem:[#allocation7 + $0x1a8] ss:$16 sps:$4 sm:$0xff]  }
 0x1a9   :  { %v1070_v0 = vmul.f32 %v2106_v61, %v500_v34  ;;  %v1074_v1 = vmul.f32 %v1066_v60, %v967_v38  ;;  %1003 = vmatpush1.bf16.xpose.msra.mxu1 %v2034_v55  ;;  %v2079_v34 = vld [vmem:[#allocation7 + $0x188] ss:$16 sps:$4 sm:$0xff]   ;;  %v2087_v38 = vld [vmem:[#allocation7 + $0x1cc] ss:$16 sps:$4 sm:$0xff]  }
 0x1aa   :  { %v1077_v3 = vmul.f32 %v1069_v62, %v969_v40  ;;  %1004 = vmatprep.subr.bf16.mxu1 %v2042_v58  ;;  %v2090_v40 = vld [vmem:[#allocation7 + $0x1ec] ss:$16 sps:$4 sm:$0xff]  }
 0x1ab   :  { %v1078_v4 = vmul.f32 %v1070_v0, %v971_v41  ;;  %v2088_v41 = vld [vmem:[#allocation7 + $0x1e8] ss:$16 sps:$4 sm:$0xff]  }
 0x1ac   :  { %v1149_v5 = vpack.c.bf16 %v1077_v3, %v1073_v63 }
 0x1ad   :  { %v1150_v6 = vpack.c.bf16 %v1078_v4, %v1074_v1 }
 0x1af   :  { %1505 = vmatprep.mubr.bf16.mxu0 %v1150_v6 }
 0x1b0   :  { %1506 = vmatmul.mubr.bf16.vlgmr.msra.gmra.mrb[4].mxu0 %v1149_v5 }
 0x1b1   :  { %1005 = vmatpush1.bf16.xpose.msra.mxu1 %v2040_v7  ;;  %1517 = vmatpush1.bf16.xpose.msra.mxu0 %v2043_v8 }
 0x1b2   :  { %1518 = vmatprep.subr.bf16.mxu0 %v2048_v9 }
 0x1b8   :  { %1007 = vmatmul.mubr.bf16.vlgmr.msra.gmra.mrb[8].mxu1 %v2295_v2  ;;  %v2066_v2 = vld [vmem:[#allocation7 + $0xec] ss:$16 sps:$4 sm:$0xff]  }
 0x1b9   :  { %1519 = vmatpush1.bf16.xpose.msra.mxu0 %v2046_v10 }
 0x1ba   :  { %1520 = vmatprep.subr.bf16.mxu0 %v2051_v11 }
 0x1c1   :  { %1521 = vmatpush1.bf16.xpose.msra.mxu0 %v2049_v12 }
 0x1c2   :  { %1522 = vmatprep.subr.bf16.mxu0 %v2054_v13 }
 0x1c9   :  { %1523 = vmatpush1.bf16.xpose.msra.mxu0 %v2052_v14 }
 0x1ca   :  { %1524 = vmatprep.subr.bf16.mxu0 %v2057_v15 }
 0x1d1   :  { %1525 = vmatpush1.bf16.xpose.msra.mxu0 %v2055_v16 }
 0x1d2   :  { %1526 = vmatprep.subr.bf16.mxu0 %v2060_v23 }
 0x1d9   :  { %1527 = vmatpush1.bf16.xpose.msra.mxu0 %v2058_v17 }
 0x1da   :  { %1528 = vmatprep.subr.bf16.mxu0 %v2063_v18 }
 0x1e1   :  { %1529 = vmatpush1.bf16.xpose.msra.mxu0 %v2061_v19 }
 0x1e2   :  { %1530 = vmatprep.subr.bf16.mxu0 %v2066_v2 }
 0x1e9   :  { %1531 = vmatpush1.bf16.xpose.msra.mxu0 %v2064_v20 }
 0x1ea   :  { %1532 = vmatprep.subr.bf16.mxu0 %v2069_v21 }
 0x1f1   :  { %1533 = vmatpush1.bf16.xpose.msra.mxu0 %v2067_v22 }
 0x1f2   :  { %1534 = vmatprep.subr.bf16.mxu0 %v2072_v24 }
 0x1f9   :  { %1535 = vmatpush1.bf16.xpose.msra.mxu0 %v2070_v25 }
 0x1fa   :  { %1536 = vmatprep.subr.bf16.mxu0 %v2075_v26 }
 0x201   :  { %1537 = vmatpush1.bf16.xpose.msra.mxu0 %v2073_v27 }
 0x202   :  { %1538 = vmatprep.subr.bf16.mxu0 %v2078_v28 }
 0x209   :  { %1539 = vmatpush1.bf16.xpose.msra.mxu0 %v2076_v29 }
 0x20a   :  { %1540 = vmatprep.subr.bf16.mxu0 %v2081_v30 }
 0x20b   :  { %v537_v31 = vpop.f32.mrb[4].mxu1 }
 0x20c   :  { %v539_v32 = vpop.f32.mrb[5].mxu1  ;;  %v1717_v42 = vmul.f32 -1.442695, %v537_v31 }
 0x20d   :  { %v541_v33 = vpop.f32.mrb[6].mxu1  ;;  %v1718_v43 = vmul.f32 -1.442695, %v539_v32 }
 0x20e   :  { %v543_v35 = vpop.f32.mrb[7].mxu1  ;;  %v1721_v44 = vmul.f32 -1.442695, %v541_v33  ;;  %2107 = vpow2.f32 %v1717_v42 }
 0x20f   :  { %v1722_v45 = vmul.f32 -1.442695, %v543_v35  ;;  %2109 = vpow2.f32 %v1718_v43 }
 0x210   :  { %2111 = vpow2.f32 %v1721_v44 }
 0x211   :  { %1541 = vmatpush1.bf16.xpose.msra.mxu0 %v2079_v34  ;;  %2113 = vpow2.f32 %v1722_v45 }
 0x212   :  { %1542 = vmatprep.subr.bf16.mxu0 %v2084_v36 }
 0x218   :  { %v2108_v46 = vpop.eup %2107 }
 0x219   :  { %1543 = vmatpush1.bf16.xpose.msra.mxu0 %v2082_v37  ;;  %v2110_v47 = vpop.eup %2109  ;;  %v1043_v50 = vadd.f32 1.0, %v2108_v46 }
 0x21a   :  { %1544 = vmatprep.subr.bf16.mxu0 %v2087_v38  ;;  %v2112_v48 = vpop.eup %2111  ;;  %v1044_v51 = vadd.f32 1.0, %v2110_v47 }
 0x21b   :  { %v2114_v49 = vpop.eup %2113  ;;  %v1047_v52 = vadd.f32 1.0, %v2112_v48  ;;  %2115 = vrcp.f32 %v1043_v50 }
 0x21c   :  { %v1048_v53 = vadd.f32 1.0, %v2114_v49  ;;  %2117 = vrcp.f32 %v1044_v51 }
 0x21d   :  { %2119 = vrcp.f32 %v1047_v52 }
 0x21e   :  { %2121 = vrcp.f32 %v1048_v53 }
 0x221   :  { %1545 = vmatpush1.bf16.xpose.msra.mxu0 %v2085_v39 }
 0x222   :  { %1546 = vmatprep.subr.bf16.mxu0 %v2090_v40 }
 0x225   :  { %v2116_v54 = vpop.eup %2115 }
 0x226   :  { %v2118_v55 = vpop.eup %2117  ;;  %v1067_v58 = vmul.f32 %v2116_v54, %v537_v31 }
 0x227   :  { %v2120_v56 = vpop.eup %2119  ;;  %v1068_v59 = vmul.f32 %v2118_v55, %v539_v32 }
 0x228   :  { %v2122_v57 = vpop.eup %2121  ;;  %v1071_v61 = vmul.f32 %v2120_v56, %v541_v33 }
 0x229   :  { %1547 = vmatpush1.bf16.xpose.msra.mxu0 %v2088_v41  ;;  %v1072_v0 = vmul.f32 %v2122_v57, %v543_v35 }
 0x28b   :  { %v1008_v60 = vpop.f32.mrb[8].mxu1 }
 0x28c   :  { %v1075_v62 = vmul.f32 %v1067_v58, %v1008_v60  ;;  %v1010_v63 = vpop.f32.mrb[9].mxu1 }
 0x28d   :  { %v1076_v1 = vmul.f32 %v1068_v59, %v1010_v63  ;;  %v1012_v3 = vpop.f32.mrb[10].mxu1 }
 0x28e   :  { %v1079_v4 = vmul.f32 %v1071_v61, %v1012_v3  ;;  %v1014_v5 = vpop.f32.mrb[11].mxu1 }
 0x28f   :  { %v1080_v6 = vmul.f32 %v1072_v0, %v1014_v5 }
 0x290   :  { %v1151_v7 = vpack.c.bf16 %v1079_v4, %v1075_v62 }
 0x291   :  { %v1152_v8 = vpack.c.bf16 %v1080_v6, %v1076_v1 }
 0x293   :  { %1548 = vmatprep.mubr.bf16.mxu0 %v1152_v8 }
 0x294   :  { %1549 = vmatmul.mubr.bf16.vlgmr.msra.gmra.mrb[4].mxu0 %v1151_v7 }
 0x367   :  { %v1550_v9 = vpop.f32.mrb[4].mxu0 }
 0x368   :  { %v1552_v10 = vpop.f32.mrb[5].mxu0  ;;  %1563 = vst [vmem:[#allocation8] sm:$0xff] %v1550_v9 }
 0x369   :  { %v1554_v11 = vpop.f32.mrb[6].mxu0  ;;  %1564 = vst [vmem:[#allocation8 + $0x8] sm:$0xff] %v1552_v10 }
 0x36a   :  { %v1556_v12 = vpop.f32.mrb[7].mxu0  ;;  %1565 = vst [vmem:[#allocation8 + $0x10] sm:$0xff] %v1554_v11 }
 0x36b   :  { %1566 = vst [vmem:[#allocation8 + $0x18] sm:$0xff] %v1556_v12 }
 0x36c   :  { %2200 = shalt.err (!%p2197_p0)
}
 0x36d   :  { %s2201_s27 = scalar_lea.hbm %s2321_s3, 512 }
 0x36e   :  { %p2202_p1 = scmp.ne.s32.totalorder %s2321_s3, %s2201_s27  ;;  %p2205_p2 = scmp.lt.u32.totalorder %s2201_s27, %s2321_s3 }
 0x370   :  { %p2207_p3 = pnand %p2205_p2, %p2202_p1 }
 0x372   :  { %2210 = shalt.err (!%p2207_p3)
}
 0x373   :  { %1578 = dma.vmem_to_hbm [thread:$0]  %s1573_s23, 512, %s2321_s3, [#allocation4], %s2222_s0, %s2222_s0, %s2223_s15  }
 0x374   :  { %2215 = dma.done.wait [#allocation4], 512  }
 0x375   :  { %2216 = vsyncadd [#allocation4], 4294966784 }
 0x376   :  { %1582 = vsyncpa [#allocation3], 1 }
 0x377   :  { %1583 = vsyncpa [#allocation6], 1 }
 0x378   :  { %1584 = vsyncpa [#allocation4], 1 }

</bundles_post_ra>
